<compile_context>
chip_gen: v5e
topology: v5e:2x2
jax: 0.10.0
libtpu: 0.0.40
codegen_flags: <defaults>
</compile_context>

<pallas_src>
import functools

import jax
import jax.numpy as jnp
from jax import lax
from jax.experimental import pallas as pl
from jax.experimental.pallas import tpu as pltpu

# ----------------------------- configuration ---------------------------------
BEV_FEAT_SHAPE = 8          # Hq = Wq
BEV_DEPTH_DIM = 2           # D
DIM_EMBED = 16              # C (embed_dim)
N_HEADS = 2
N_GROUPS = 2
N_VIEWS = 1                 # see TODO(synk) above
BATCH = 2
IMG_H = IMG_W = 8
SCALE_OFFSET_RANGE = True
OFFSET_RANGE_FACTOR = 5.0
LN_EPS = 1e-5

N_CH_PER_HEAD = DIM_EMBED // N_HEADS           # Ch = 8
N_CH_PER_GROUP = DIM_EMBED // N_GROUPS         # Cg = 8
N_HEADS_PER_GROUP = N_HEADS // N_GROUPS        # 1
ATTN_SCALE = float(N_CH_PER_HEAD) ** (-0.5)

HQ = WQ = BEV_FEAT_SHAPE
HK = HQ // 2                                   # 4
WK = WQ * BEV_DEPTH_DIM                        # 16
N_SAMPLE = HK * WK                             # 64
M_QUERY = HQ * WQ                              # 64
RPE_H = 2 * HQ - 1                             # 15
RPE_W = 2 * WQ * BEV_DEPTH_DIM - 1             # 31

# MXU operand dtype: bf16 inputs with f32 accumulation hit the MXU bf16 peak on
# v5e/v6e/v7x; all softmax / bias / normalization math stays in f32.
MXU_DTYPE = jnp.bfloat16


# ----------------------------- Pallas kernel ----------------------------------
def _fused_attn_kernel(q_ref, xs_ref, kvw_ref, kvb_ref, bias_ref,
                       wout_ref, bout_ref, o_ref, *,
                       scale, n_heads, ch_per_head, c_embed, mxu_dtype):
    """One batch element: merged k/v projection, all heads of deformable
    attention, and the fused output projection.

    q_ref:    (H, Ch, M)   query, channels-first per head
    xs_ref:   (1, C, N)    grid-sampled features for this batch element
    kvw_ref:  (2C, C)      [W_k ; W_v]
    kvb_ref:  (2C, 1)      [b_k ; b_v]
    bias_ref: (H, M, N)    relative-position attention bias
    wout_ref: (C, C)       proj_out weight (V*C == C since n_views == 1)
    bout_ref: (C, 1)       proj_out bias
    o_ref:    (1, C, M)    final projected output
    """
    # Merged proj_k / proj_v as one MXU pass; biases are a tiny VPU broadcast
    # add (no ones-row augmentation, so the contraction dim stays K = C).
    kv = jnp.dot(kvw_ref[...].astype(mxu_dtype),
                 xs_ref[0].astype(mxu_dtype),
                 preferred_element_type=jnp.float32) + kvb_ref[...]    # (2C, N)

    head_outs = []
    for h in range(n_heads):                                           # static unroll
        q_h = q_ref[h].astype(mxu_dtype)                               # (Ch, M)
        k_h = kv[h * ch_per_head:(h + 1) * ch_per_head]                # (Ch, N)
        v_h = kv[c_embed + h * ch_per_head:c_embed + (h + 1) * ch_per_head]
        # s[m, n] = sum_c q[c, m] * k[c, n]   (contract over channels)
        s = lax.dot_general(q_h, k_h.astype(mxu_dtype),
                            (((0,), (0,)), ((), ())),
                            preferred_element_type=jnp.float32)        # (M, N)
        s = s * scale + bias_ref[h]
        s = s - jnp.max(s, axis=-1, keepdims=True)
        p = jnp.exp(s)
        l = jnp.sum(p, axis=-1)                                        # (M,)
        # o[c, m] = sum_n v[c, n] * p[m, n]; normalize AFTER the PV matmul
        # ((Ch, M) elems instead of (M, N)) so the EUP reciprocal overlaps MXU.
        o_h = lax.dot_general(v_h.astype(mxu_dtype), p.astype(mxu_dtype),
                              (((1,), (1,)), ((), ())),
                              preferred_element_type=jnp.float32)      # (Ch, M)
        o_h = o_h * pl.reciprocal(l[None, :], approx=True)
        head_outs.append(o_h)

    # Fused proj_out epilogue: stack heads -> (C, M), one MXU pass + bias add.
    attn_out = jnp.concatenate(head_outs, axis=0)                      # (C, M)
    out = jnp.dot(wout_ref[...].astype(mxu_dtype),
                  attn_out.astype(mxu_dtype),
                  preferred_element_type=jnp.float32) + bout_ref[...]  # (C, M)
    o_ref[0] = out.astype(o_ref.dtype)


def fused_deformable_attention(q, x_sampled, kvw, kvb, attn_bias, w_out, b_out,
                               *, n_heads, scale):
    """q: (B*H, Ch, M), x_sampled: (B, C, N), kvw: (2C, C), kvb: (2C, 1),
    attn_bias: (B*H, M, N), w_out: (C, C), b_out: (C, 1)  ->  (B, C, M).

    Grid = (B,) marked "parallel": v7x shards the two batch steps across its
    two TensorCores; v5e/v6e run a 2-step serial loop of one fused kernel."""
    BH, Ch, M = q.shape
    B, C, N = x_sampled.shape
    C2 = kvw.shape[0]
    H = n_heads
    kernel = functools.partial(_fused_attn_kernel, scale=scale, n_heads=H,
                               ch_per_head=Ch, c_embed=C2 // 2,
                               mxu_dtype=MXU_DTYPE)
    # Advisory cost estimate so XLA schedules the surrounding grid_sample glue
    # around the custom call instead of serializing on it.
    flops = B * (2 * C2 * C * N           # merged k/v projection
                 + H * 4 * M * Ch * N     # QK^T and PV per head
                 + 2 * C * C * M)         # fused proj_out
    transcendentals = B * H * (M * N + M)                   # exp + reciprocal
    bytes_accessed = 4 * (q.size + x_sampled.size + kvw.size + kvb.size
                          + attn_bias.size + w_out.size + b_out.size + B * C * M)
    return pl.pallas_call(
        kernel,
        out_shape=jax.ShapeDtypeStruct((B, C, M), q.dtype),
        grid=(B,),
        in_specs=[
            pl.BlockSpec((H, Ch, M), lambda i: (i, 0, 0)),
            pl.BlockSpec((1, C, N), lambda i: (i, 0, 0)),
            pl.BlockSpec((C2, C), lambda i: (0, 0)),
            pl.BlockSpec((C2, 1), lambda i: (0, 0)),
            pl.BlockSpec((H, M, N), lambda i: (i, 0, 0)),
            pl.BlockSpec((C, C), lambda i: (0, 0)),
            pl.BlockSpec((C, 1), lambda i: (0, 0)),
        ],
        out_specs=pl.BlockSpec((1, C, M), lambda i: (i, 0, 0)),
        compiler_params=pltpu.CompilerParams(
            dimension_semantics=("parallel",)),
        cost_estimate=pl.CostEstimate(flops=flops,
                                      transcendentals=transcendentals,
                                      bytes_accessed=bytes_accessed),
    )(q, x_sampled, kvw, kvb, attn_bias, w_out, b_out)


# ----------------------------- JAX glue helpers -------------------------------
def grid_sample_bilinear_zeros(img, grid):
    """Exact F.grid_sample(mode='bilinear', padding_mode='zeros',
    align_corners=True), gather-free (separable tent-weight einsums).
    img: (B, C, H, W); grid: (B, ..., 2) with last dim (x, y) in [-1, 1]."""
    B, C, H, W = img.shape
    gshape = grid.shape[1:-1]
    g = grid.reshape(B, -1, 2)
    ix = (g[..., 0] + 1.0) * 0.5 * (W - 1)                    # (B, P)
    iy = (g[..., 1] + 1.0) * 0.5 * (H - 1)
    cols = jnp.arange(W, dtype=img.dtype)
    rows = jnp.arange(H, dtype=img.dtype)
    wx = jnp.maximum(1.0 - jnp.abs(ix[..., None] - cols), 0.0)  # (B, P, W)
    wy = jnp.maximum(1.0 - jnp.abs(iy[..., None] - rows), 0.0)  # (B, P, H)
    tmp = jnp.einsum("bchw,bpw->bcph", img, wx)
    out = jnp.einsum("bcph,bph->bcp", tmp, wy)
    return out.reshape(B, C, *gshape)


def make_normalized_grid(H, W, Bn, dtype=jnp.float32):
    """(Bn, H, W, 2) grid in (y, x) order, values in [-1, 1] (align_corners)."""
    ys = jnp.arange(H, dtype=dtype) / (H - 1.0) * 2.0 - 1.0
    xs = jnp.arange(W, dtype=dtype) / (W - 1.0) * 2.0 - 1.0
    gy, gx = jnp.meshgrid(ys, xs, indexing="ij")
    g = jnp.stack([gy, gx], axis=-1)
    return jnp.broadcast_to(g[None], (Bn, H, W, 2))


def init_params(key):
    D, Cg, C, V = BEV_DEPTH_DIM, N_CH_PER_GROUP, DIM_EMBED, N_VIEWS
    ks = jax.random.split(key, 10)
    f32 = jnp.float32
    return {
        # conv_offset_m0: grouped 1x1 conv (groups=Cg) -> LayerNormProxy -> GELU -> 1x1 conv
        "m0_w1": 0.2 * jax.random.normal(ks[0], (Cg * D,), f32),
        "m0_b1": 0.1 * jax.random.normal(ks[1], (Cg * D,), f32),
        "m0_ln_g": jnp.ones((Cg * D,), f32),
        "m0_ln_b": jnp.zeros((Cg * D,), f32),
        "m0_w2": 0.2 * jax.random.normal(ks[2], (D, Cg * D), f32),
        # 1x1 projections
        "proj_k_w": 0.2 * jax.random.normal(ks[3], (C, C), f32),
        "proj_k_b": 0.05 * jax.random.normal(ks[4], (C,), f32),
        "proj_v_w": 0.2 * jax.random.normal(ks[5], (C, C), f32),
        "proj_v_b": 0.05 * jax.random.normal(ks[6], (C,), f32),
        "proj_out_w": 0.2 * jax.random.normal(ks[7], (C, V * C), f32),
        "proj_out_b": 0.05 * jax.random.normal(ks[8], (C,), f32),
        # relative position bias table
        "rpe_table": 0.01 * jax.random.normal(ks[9], (N_HEADS, RPE_H, RPE_W), f32),
    }


# ----------------------------- forward pass -----------------------------------
@jax.jit
def sca_deformable_attention(params, x, query, reference_points):
    """x: (B, V, C, Hi, Wi), query: (B, C, Hq, Wq),
    reference_points: (B, V, Hk, Wk, 2) in (x, y) order, values in [-1, 1].
    returns: (B, C, Hq, Wq)."""
    B, V, C, Hi, Wi = x.shape
    Hq, Wq = query.shape[-2:]
    G, D, H = N_GROUPS, BEV_DEPTH_DIM, N_HEADS
    Cg, Ch, nhpg = N_CH_PER_GROUP, N_CH_PER_HEAD, N_HEADS_PER_GROUP

    if V != 1:
        # TODO(synk): views 1/2 are shape-inconsistent in the reference module
        # (conv_offset_m1/m2 emit 2*D channels into a D-channel rearrange).
        raise NotImplementedError("only the self-consistent n_views == 1 branch")

    # Merged proj_k / proj_v weights; biases are small (2C, 1) VMEM inputs
    # added on the VPU inside the kernel (no ones-row augmentation).
    kvw = jnp.concatenate([params["proj_k_w"], params["proj_v_w"]], axis=0)   # (2C, C)
    kvb = jnp.concatenate([params["proj_k_b"], params["proj_v_b"]])[:, None]  # (2C, 1)
    w_out = params["proj_out_w"]                                              # (C, V*C) == (C, C)
    b_out = params["proj_out_b"][:, None]                                     # (C, 1)

    # q stays channels-first (B*H, Ch, M): no wrapper transposes around the kernel.
    q_all = query.reshape(B * H, Ch, Hq * Wq)

    # (x, y) -> (y, x); repeat over groups: 'b v h w n -> (b g) v h w n'
    ref = reference_points[..., ::-1]
    ref = jnp.repeat(ref, G, axis=0)                             # (B*G, V, Hk, Wk, 2)

    view_idx = 0
    x_view = x[:, view_idx]                                      # (B, C, Hi, Wi)
    ref_view = ref[:, view_idx]                                  # (B*G, Hk, Wk, 2)

    # ---- offset network (conv_offset_m0), plain-JAX glue ----
    qg = query.reshape(B, G, Cg, Hq, Wq).reshape(B * G, Cg, Hq, Wq)
    # grouped 1x1 conv: out channel c*D+j uses input channel c
    t = qg[:, :, None] * params["m0_w1"].reshape(1, Cg, D, 1, 1) \
        + params["m0_b1"].reshape(1, Cg, D, 1, 1)
    t = t.reshape(B * G, Cg * D, Hq, Wq)
    # LayerNormProxy: LayerNorm over the channel dim at each spatial location
    mu = jnp.mean(t, axis=1, keepdims=True)
    var = jnp.mean((t - mu) ** 2, axis=1, keepdims=True)
    t = (t - mu) / jnp.sqrt(var + LN_EPS)
    t = t * params["m0_ln_g"].reshape(1, -1, 1, 1) + params["m0_ln_b"].reshape(1, -1, 1, 1)
    t = jax.nn.gelu(t, approximate=False)
    offset = jnp.einsum("oc,bchw->bohw", params["m0_w2"], t)     # (B*G, D, Hq, Wq)

    Hk, Wk = Hq // 2, Wq * D
    n_sample = Hk * Wk
    # einops '(b g) d (h n) w -> (b g) n h (w d)'
    offset = offset.reshape(B * G, D, Hk, 2, Wq)
    offset = offset.transpose(0, 3, 2, 4, 1).reshape(B * G, 2, Hk, Wk)
    if SCALE_OFFSET_RANGE:
        off_range = jnp.array([1.0 / (Hk - 1.0), 1.0 / (Wk - 1.0)],
                              dtype=offset.dtype).reshape(1, 2, 1, 1)
        offset = jnp.tanh(offset) * off_range * OFFSET_RANGE_FACTOR
    offset = offset.transpose(0, 2, 3, 1)                        # (B*G, Hk, Wk, 2) (y,x)
    if SCALE_OFFSET_RANGE:
        ref_w_offset = offset + ref_view
    else:
        ref_w_offset = jnp.clip(offset + ref_view, -1.0, 1.0)

    # ---- sample k/v source features (grid_sample, glue) ----
    x_g = x_view.reshape(B * G, Cg, Hi, Wi)
    x_sampled = grid_sample_bilinear_zeros(x_g, ref_w_offset[..., ::-1])
    x_sampled = x_sampled.reshape(B, C, n_sample)                # (B, C, N)

    # ---- relative-position attention bias (grid_sample on rpe table, glue) ----
    # TODO(synk): at production BEV sizes, generate this bias tile-by-tile
    # inside an N-tiled online-softmax attention kernel instead of
    # materializing (B*H, M, N) in HBM (first thing to blow v7x's 64 MiB VMEM).
    q_grid = make_normalized_grid(Hq, Wq, B * G, query.dtype)        # (B*G, Hq, Wq, 2)
    disp = (q_grid.reshape(B * G, Hq * Wq, 1, 2)
            - ref_w_offset.reshape(B * G, 1, n_sample, 2)) * 0.5     # (B*G, M, N, 2)
    rpe = jnp.broadcast_to(params["rpe_table"][None], (B, H, RPE_H, RPE_W))
    rpe = rpe.reshape(B * G, nhpg, RPE_H, RPE_W)
    attn_bias = grid_sample_bilinear_zeros(rpe, disp[..., ::-1])     # (B*G, nhpg, M, N)
    attn_bias = attn_bias.reshape(B * H, Hq * Wq, n_sample)

    # ---- fused Pallas kernel: k/v proj + attention + softmax + PV + proj_out ----
    out = fused_deformable_attention(q_all, x_sampled, kvw, kvb, attn_bias,
                                     w_out, b_out,
                                     n_heads=H, scale=ATTN_SCALE)    # (B, C, M)
    return out.reshape(B, C, Hq, Wq)


# ----------------------------- demo / smoke test -------------------------------
if __name__ == "__main__":
    key = jax.random.PRNGKey(0)
    k_params, k_x, k_q, k_ref = jax.random.split(key, 4)

    params = init_params(k_params)
    x = jax.random.normal(k_x, (BATCH, N_VIEWS, DIM_EMBED, IMG_H, IMG_W), jnp.float32)
    query = jax.random.normal(k_q, (BATCH, DIM_EMBED, HQ, WQ), jnp.float32)
    reference_points = jax.random.uniform(
        k_ref, (BATCH, N_VIEWS, HK, WK, 2), jnp.float32, minval=-1.0, maxval=1.0)

    out = sca_deformable_attention(params, x, query, reference_points)
    out = jax.block_until_ready(out)
    assert out.shape == (BATCH, DIM_EMBED, HQ, WQ)
    assert bool(jnp.all(jnp.isfinite(out)))
    print("KERNEL_OK")
</pallas_src>

<mosaic_0001>
module attributes {stable_mosaic.version = 11 : i64} {
  func.func @_fused_attn_kernel(%arg0: i32, %arg1: memref<2x8x64xf32, #tpu.memory_space<vmem>>, %arg2: memref<1x16x64xf32, #tpu.memory_space<vmem>>, %arg3: memref<32x16xf32, #tpu.memory_space<vmem>>, %arg4: memref<32x1xf32, #tpu.memory_space<vmem>>, %arg5: memref<2x64x64xf32, #tpu.memory_space<vmem>>, %arg6: memref<16x16xf32, #tpu.memory_space<vmem>>, %arg7: memref<16x1xf32, #tpu.memory_space<vmem>>, %arg8: memref<1x16x64xf32, #tpu.memory_space<vmem>>) attributes {dimension_semantics = [#tpu.dimension_semantics<parallel>], iteration_bounds = array<i64: 2>, scalar_prefetch = 0 : i64, scratch_operands = 0 : i64, tpu.core_type = #tpu.core_type<tc>, window_params = [{transform_indices = @transform_0, window_bounds = array<i64: 2, 8, 64>}, {transform_indices = @transform_1, window_bounds = array<i64: 1, 16, 64>}, {pipeline_mode = #tpu.pipeline_mode<synchronous>, transform_indices = @transform_2, window_bounds = array<i64: 32, 16>}, {pipeline_mode = #tpu.pipeline_mode<synchronous>, transform_indices = @transform_3, window_bounds = array<i64: 32, 1>}, {transform_indices = @transform_4, window_bounds = array<i64: 2, 64, 64>}, {pipeline_mode = #tpu.pipeline_mode<synchronous>, transform_indices = @transform_5, window_bounds = array<i64: 16, 16>}, {pipeline_mode = #tpu.pipeline_mode<synchronous>, transform_indices = @transform_6, window_bounds = array<i64: 16, 1>}, {transform_indices = @transform_7, window_bounds = array<i64: 1, 16, 64>}]} {
    %c0 = arith.constant 0 : index
    %c0_0 = arith.constant 0 : index
    %0 = vector.load %arg3[%c0, %c0_0] : memref<32x16xf32, #tpu.memory_space<vmem>>, vector<32x16xf32>
    %1 = arith.truncf %0 : vector<32x16xf32> to vector<32x16xbf16>
    %c0_1 = arith.constant 0 : index
    %c0_2 = arith.constant 0 : index
    %c0_3 = arith.constant 0 : index
    %2 = vector.load %arg2[%c0_1, %c0_2, %c0_3] : memref<1x16x64xf32, #tpu.memory_space<vmem>>, vector<1x16x64xf32>
    %3 = vector.shape_cast %2 : vector<1x16x64xf32> to vector<16x64xf32>
    %4 = arith.truncf %3 : vector<16x64xf32> to vector<16x64xbf16>
    %cst = arith.constant dense<0.000000e+00> : vector<32x64xf32>
    %5 = tpu.matmul %1, %4, %cst {dimension_numbers = #tpu.dot_dimension_numbers<[1], [0], [0], [1], [0, 0, 1, 1], [], []>} : vector<32x16xbf16>, vector<16x64xbf16>, vector<32x64xf32> -> vector<32x64xf32>
    %c0_4 = arith.constant 0 : index
    %c0_5 = arith.constant 0 : index
    %6 = vector.load %arg4[%c0_4, %c0_5] : memref<32x1xf32, #tpu.memory_space<vmem>>, vector<32x1xf32>
    %7 = vector.broadcast %6 : vector<32x1xf32> to vector<32x64xf32>
    %8 = arith.addf %5, %7 : vector<32x64xf32>
    %c0_6 = arith.constant 0 : index
    %c0_7 = arith.constant 0 : index
    %c0_8 = arith.constant 0 : index
    %9 = vector.load %arg1[%c0_6, %c0_7, %c0_8] : memref<2x8x64xf32, #tpu.memory_space<vmem>>, vector<1x8x64xf32>
    %10 = vector.shape_cast %9 : vector<1x8x64xf32> to vector<8x64xf32>
    %11 = arith.truncf %10 : vector<8x64xf32> to vector<8x64xbf16>
    %12 = vector.extract_strided_slice %8 {offsets = [0, 0], sizes = [8, 64], strides = [1, 1]} : vector<32x64xf32> to vector<8x64xf32>
    %13 = vector.extract_strided_slice %8 {offsets = [16, 0], sizes = [8, 64], strides = [1, 1]} : vector<32x64xf32> to vector<8x64xf32>
    %14 = arith.truncf %12 : vector<8x64xf32> to vector<8x64xbf16>
    %cst_9 = arith.constant dense<0.000000e+00> : vector<64x64xf32>
    %15 = tpu.matmul %11, %14, %cst_9 {dimension_numbers = #tpu.dot_dimension_numbers<[0], [0], [1], [1], [0, 1, 1, 1], [], []>} : vector<8x64xbf16>, vector<8x64xbf16>, vector<64x64xf32> -> vector<64x64xf32>
    %cst_10 = arith.constant 0.353553385 : f32
    %16 = vector.broadcast %cst_10 : f32 to vector<64x64xf32>
    %17 = arith.mulf %15, %16 : vector<64x64xf32>
    %c0_11 = arith.constant 0 : index
    %c0_12 = arith.constant 0 : index
    %c0_13 = arith.constant 0 : index
    %18 = vector.load %arg5[%c0_11, %c0_12, %c0_13] : memref<2x64x64xf32, #tpu.memory_space<vmem>>, vector<1x64x64xf32>
    %19 = vector.shape_cast %18 : vector<1x64x64xf32> to vector<64x64xf32>
    %20 = arith.addf %17, %19 : vector<64x64xf32>
    %cst_14 = arith.constant dense<0xFF800000> : vector<64xf32>
    %21 = vector.multi_reduction <maximumf>, %20, %cst_14 [1] : vector<64x64xf32> to vector<64xf32>
    %22 = vector.shape_cast %21 : vector<64xf32> to vector<64x1xf32>
    %23 = vector.broadcast %22 : vector<64x1xf32> to vector<64x64xf32>
    %24 = arith.subf %20, %23 : vector<64x64xf32>
    %25 = math.exp %24 : vector<64x64xf32>
    %cst_15 = arith.constant dense<0.000000e+00> : vector<64xf32>
    %26 = vector.multi_reduction <add>, %25, %cst_15 [1] : vector<64x64xf32> to vector<64xf32>
    %27 = arith.truncf %13 : vector<8x64xf32> to vector<8x64xbf16>
    %28 = arith.truncf %25 : vector<64x64xf32> to vector<64x64xbf16>
    %cst_16 = arith.constant dense<0.000000e+00> : vector<8x64xf32>
    %29 = tpu.matmul %27, %28, %cst_16 {dimension_numbers = #tpu.dot_dimension_numbers<[1], [1], [0], [0], [0, 0, 1, 0], [], []>} : vector<8x64xbf16>, vector<64x64xbf16>, vector<8x64xf32> -> vector<8x64xf32>
    %30 = vector.shape_cast %26 : vector<64xf32> to vector<1x64xf32>
    %31 = tpu.reciprocal %30 {approx = true} : vector<1x64xf32> -> vector<1x64xf32>
    %32 = vector.broadcast %31 : vector<1x64xf32> to vector<8x64xf32>
    %33 = arith.mulf %29, %32 : vector<8x64xf32>
    %c1 = arith.constant 1 : index
    %c0_17 = arith.constant 0 : index
    %c0_18 = arith.constant 0 : index
    %34 = vector.load %arg1[%c1, %c0_17, %c0_18] : memref<2x8x64xf32, #tpu.memory_space<vmem>>, vector<1x8x64xf32>
    %35 = vector.shape_cast %34 : vector<1x8x64xf32> to vector<8x64xf32>
    %36 = arith.truncf %35 : vector<8x64xf32> to vector<8x64xbf16>
    %37 = vector.extract_strided_slice %8 {offsets = [8, 0], sizes = [8, 64], strides = [1, 1]} : vector<32x64xf32> to vector<8x64xf32>
    %38 = vector.extract_strided_slice %8 {offsets = [24, 0], sizes = [8, 64], strides = [1, 1]} : vector<32x64xf32> to vector<8x64xf32>
    %39 = arith.truncf %37 : vector<8x64xf32> to vector<8x64xbf16>
    %cst_19 = arith.constant dense<0.000000e+00> : vector<64x64xf32>
    %40 = tpu.matmul %36, %39, %cst_19 {dimension_numbers = #tpu.dot_dimension_numbers<[0], [0], [1], [1], [0, 1, 1, 1], [], []>} : vector<8x64xbf16>, vector<8x64xbf16>, vector<64x64xf32> -> vector<64x64xf32>
    %cst_20 = arith.constant 0.353553385 : f32
    %41 = vector.broadcast %cst_20 : f32 to vector<64x64xf32>
    %42 = arith.mulf %40, %41 : vector<64x64xf32>
    %c1_21 = arith.constant 1 : index
    %c0_22 = arith.constant 0 : index
    %c0_23 = arith.constant 0 : index
    %43 = vector.load %arg5[%c1_21, %c0_22, %c0_23] : memref<2x64x64xf32, #tpu.memory_space<vmem>>, vector<1x64x64xf32>
    %44 = vector.shape_cast %43 : vector<1x64x64xf32> to vector<64x64xf32>
    %45 = arith.addf %42, %44 : vector<64x64xf32>
    %cst_24 = arith.constant dense<0xFF800000> : vector<64xf32>
    %46 = vector.multi_reduction <maximumf>, %45, %cst_24 [1] : vector<64x64xf32> to vector<64xf32>
    %47 = vector.shape_cast %46 : vector<64xf32> to vector<64x1xf32>
    %48 = vector.broadcast %47 : vector<64x1xf32> to vector<64x64xf32>
    %49 = arith.subf %45, %48 : vector<64x64xf32>
    %50 = math.exp %49 : vector<64x64xf32>
    %cst_25 = arith.constant dense<0.000000e+00> : vector<64xf32>
    %51 = vector.multi_reduction <add>, %50, %cst_25 [1] : vector<64x64xf32> to vector<64xf32>
    %52 = arith.truncf %38 : vector<8x64xf32> to vector<8x64xbf16>
    %53 = arith.truncf %50 : vector<64x64xf32> to vector<64x64xbf16>
    %cst_26 = arith.constant dense<0.000000e+00> : vector<8x64xf32>
    %54 = tpu.matmul %52, %53, %cst_26 {dimension_numbers = #tpu.dot_dimension_numbers<[1], [1], [0], [0], [0, 0, 1, 0], [], []>} : vector<8x64xbf16>, vector<64x64xbf16>, vector<8x64xf32> -> vector<8x64xf32>
    %55 = vector.shape_cast %51 : vector<64xf32> to vector<1x64xf32>
    %56 = tpu.reciprocal %55 {approx = true} : vector<1x64xf32> -> vector<1x64xf32>
    %57 = vector.broadcast %56 : vector<1x64xf32> to vector<8x64xf32>
    %58 = arith.mulf %54, %57 : vector<8x64xf32>
    %59 = tpu.concatenate %33, %58 in 0 : vector<8x64xf32>, vector<8x64xf32> -> vector<16x64xf32>
    %c0_27 = arith.constant 0 : index
    %c0_28 = arith.constant 0 : index
    %60 = vector.load %arg6[%c0_27, %c0_28] : memref<16x16xf32, #tpu.memory_space<vmem>>, vector<16x16xf32>
    %61 = arith.truncf %60 : vector<16x16xf32> to vector<16x16xbf16>
    %62 = arith.truncf %59 : vector<16x64xf32> to vector<16x64xbf16>
    %cst_29 = arith.constant dense<0.000000e+00> : vector<16x64xf32>
    %63 = tpu.matmul %61, %62, %cst_29 {dimension_numbers = #tpu.dot_dimension_numbers<[1], [0], [0], [1], [0, 0, 1, 1], [], []>} : vector<16x16xbf16>, vector<16x64xbf16>, vector<16x64xf32> -> vector<16x64xf32>
    %c0_30 = arith.constant 0 : index
    %c0_31 = arith.constant 0 : index
    %64 = vector.load %arg7[%c0_30, %c0_31] : memref<16x1xf32, #tpu.memory_space<vmem>>, vector<16x1xf32>
    %65 = vector.broadcast %64 : vector<16x1xf32> to vector<16x64xf32>
    %66 = arith.addf %63, %65 : vector<16x64xf32>
    %c0_32 = arith.constant 0 : index
    %c0_33 = arith.constant 0 : index
    %c0_34 = arith.constant 0 : index
    %67 = vector.load %arg8[%c0_32, %c0_33, %c0_34] : memref<1x16x64xf32, #tpu.memory_space<vmem>>, vector<1x16x64xf32>
    %68 = vector.shape_cast %67 : vector<1x16x64xf32> to vector<16x64xf32>
    %69 = vector.shape_cast %66 : vector<16x64xf32> to vector<1x16x64xf32>
    tpu.vector_store %arg8[%c0_32, %c0_33, %c0_34], %69 {strides = array<i32>} : memref<1x16x64xf32, #tpu.memory_space<vmem>>, vector<1x16x64xf32>,
    return
  }
  func.func @transform_0(%arg0: i32) -> (i32, i32, i32) {
    %c0_i32 = arith.constant 0 : i32
    %c0_i32_0 = arith.constant 0 : i32
    %c0_i32_1 = arith.constant 0 : i32
    return %arg0, %c0_i32, %c0_i32_0 : i32, i32, i32
  }
  func.func @transform_1(%arg0: i32) -> (i32, i32, i32) {
    %c0_i32 = arith.constant 0 : i32
    %c0_i32_0 = arith.constant 0 : i32
    %c0_i32_1 = arith.constant 0 : i32
    return %arg0, %c0_i32, %c0_i32_0 : i32, i32, i32
  }
  func.func @transform_2(%arg0: i32) -> (i32, i32) {
    %c0_i32 = arith.constant 0 : i32
    %c0_i32_0 = arith.constant 0 : i32
    %c0_i32_1 = arith.constant 0 : i32
    return %c0_i32, %c0_i32_0 : i32, i32
  }
  func.func @transform_3(%arg0: i32) -> (i32, i32) {
    %c0_i32 = arith.constant 0 : i32
    %c0_i32_0 = arith.constant 0 : i32
    %c0_i32_1 = arith.constant 0 : i32
    return %c0_i32, %c0_i32_0 : i32, i32
  }
  func.func @transform_4(%arg0: i32) -> (i32, i32, i32) {
    %c0_i32 = arith.constant 0 : i32
    %c0_i32_0 = arith.constant 0 : i32
    %c0_i32_1 = arith.constant 0 : i32
    return %arg0, %c0_i32, %c0_i32_0 : i32, i32, i32
  }
  func.func @transform_5(%arg0: i32) -> (i32, i32) {
    %c0_i32 = arith.constant 0 : i32
    %c0_i32_0 = arith.constant 0 : i32
    %c0_i32_1 = arith.constant 0 : i32
    return %c0_i32, %c0_i32_0 : i32, i32
  }
  func.func @transform_6(%arg0: i32) -> (i32, i32) {
    %c0_i32 = arith.constant 0 : i32
    %c0_i32_0 = arith.constant 0 : i32
    %c0_i32_1 = arith.constant 0 : i32
    return %c0_i32, %c0_i32_0 : i32, i32
  }
  func.func @transform_7(%arg0: i32) -> (i32, i32, i32) {
    %c0_i32 = arith.constant 0 : i32
    %c0_i32_0 = arith.constant 0 : i32
    %c0_i32_1 = arith.constant 0 : i32
    return %arg0, %c0_i32, %c0_i32_0 : i32, i32, i32
  }
}

</mosaic_0001>

<bundles_post_ra>
// kernel: sca_deformable_attention.1
= control target key start
LH: loop header
LB: loop body
LE: loop exit
PB: predicated region body
PF: predicated region fallthrough
CT: control target
= control target key end

     0   :  { %s1164_s24 = smov 0   ;;  %s1427_s0 = inlined_call_operand.vmem [shape: f32[4,8,64], index: 0, kind: input, shape index: {}]   ;;  %s1428_s1 = inlined_call_operand.vmem [shape: f32[2,16,64], index: 1, kind: input, shape index: {}]   ;;  %s1429_s2 = inlined_call_operand.vmem [shape: f32[32,16], index: 2, kind: input, shape index: {}]   ;;  %s1430_s3 = inlined_call_operand.vmem [shape: f32[32,1], index: 3, kind: input, shape index: {}]   ;;  %s1431_s4 = inlined_call_operand.vmem [shape: f32[4,64,64], index: 4, kind: input, shape index: {}]   ;;  %s1432_s5 = inlined_call_operand.vmem [shape: f32[16,16], index: 5, kind: input, shape index: {}]   ;;  %s1433_s6 = inlined_call_operand.vmem [shape: f32[16,1], index: 6, kind: input, shape index: {}]   ;;  %s1434_s7 = inlined_call_operand.vmem [shape: f32[2,16,64], index: 7, kind: output, shape index: {}]  }
   0x1 LB: > { %s989_s25 = sadd.s32 4294967295, %s1121_s24   ;;  %p993_p0 = scmp.ge.s32.totalorder %s1121_s24, 1  ;;  %s1121_s24 = sphi %s1164_s24, %s17_s24  }
   0x2   : > { %p260_p1 = scmp.lt.s32.totalorder %s1121_s24, 3 }
   0x4   : > { %p261_p2 = pnand %p993_p0, %p260_p1 }
   0x5   : > { %s994_s26 = sshll.u32 (!%p261_p2), %s989_s25, 1  ;;  %p309_p3 = scmp.lt.s32.totalorder (!%p261_p2), %s989_s25, 1 }
   0x6   : > { %264 = sbr.rel (%p261_p2) target bundleno = 869 (0x365), region = 48  ;;  %p304_p4 = scmp.lt.s32.totalorder (!%p261_p2), %s994_s26, 3 }
   0xb   : > { %v1123_v0 = vmov 0   ;;  %v336_v1 = vld [vmem:[%s1430_s3] sm:$0xff]  ;;  %s1436_s25 = smov (!%p309_p3, %s989_s25), 1  ;;  %s1438_s26 = smov (!%p304_p4, %s994_s26), 3  ;;  %v328_v5 = vld [vmem:[%s1429_s2 + $0x8] sm:$0xff]  ;;  %vm360_vm0 = vcmask 130048  }
   0xc   : > { %1039 = vset.pattern.permute.xlu0 %v1123_v0  ;;  %1049 = vset.pattern.permute.xlu2 %v1123_v0  ;;  %s1027_s29 = sshll.u32 %s1436_s25, 4  ;;  %s995_s30 = sshll.u32 %s1438_s26, 3  ;;  %v327_v2 = vld [vmem:[%s1429_s2] sm:$0xff]  ;;  %v337_v10 = vld [vmem:[%s1430_s3 + $0x8] sm:$0xff]  ;;  %vm418_vm1 = vcmask 1043456   ;;  %vm405_vm2 = vcmask 64512  }
   0xd   : > { %342 = vperm.xlu0 %1039, %v336_v1   ;;  %s307_s10 = scalar_lea.vmem %s1427_s0, %s995_s30  ;;  %s313_s15 = scalar_lea.vmem %s1428_s1, %s1027_s29  ;;  %v331_v12 = vpack.c.bf16 %v328_v5, %v327_v2  ;;  %vm475_vm3 = vcmask 523264   ;;  %v329_v61 = vld [vmem:[%s1429_s2 + $0x10] sm:$0xff]  ;;  %v330_v62 = vld [vmem:[%s1429_s2 + $0x18] sm:$0xff]  ;;  %vm602_vm4 = vcmask 130112   ;;  %vm606_vm5 = vcmask 195712  }
   0xe   : > { %v386_v3 = vld [vmem:[%s307_s10] sm:$0xff]  ;;  %v1010_v4 = vld [vmem:[%s307_s10 + $0x8] sm:$0xff]  ;;  %s1028_s20 = sshll.u32 %s1438_s26, 6  ;;  %v332_v1 = vpack.c.bf16 %v330_v62, %v329_v61  ;;  %vm610_vm6 = vcmask 261312   ;;  %vm614_vm7 = vcmask 326912   ;;  %vm618_vm8 = vcmask 392512   ;;  %s325_s22 = scalar_lea.vmem %s1434_s7, %s1027_s29 }
   0xf   : > { %v387_v6 = vpack.c.bf16 %v386_v3, %v386_v3  ;;  %v644_v7 = vpack.c.bf16 %v1010_v4, %v1010_v4  ;;  %v333_v8 = vld [vmem:[%s313_s15] sm:$0xff]  ;;  %v334_v9 = vld [vmem:[%s313_s15 + $0x8] sm:$0xff]  ;;  %s1215_s23 = scalar_lea.vmem %s1431_s4, %s1028_s20  ;;  %vm622_vm9 = vcmask 458112   ;;  %vm626_vm10 = vcmask 523712  }
  0x10   : > { %v335_v11 = vpack.c.bf16 %v334_v9, %v333_v8  ;;  %v1017_v38 = vld [vmem:[%s1215_s23 + $0x50] sm:$0xff]  ;;  %v463_v41 = vld [vmem:[%s1215_s23 + $0x20] sm:$0xff]  ;;  %v464_v52 = vld [vmem:[%s1215_s23 + $0x28] sm:$0xff] }
  0x11   : > { %1040 = vxpose.binary.xlu1.c.b16.start.end [1/2] (short) (narrow) %v644_v7, %v387_v6, 64  ;;  %v459_v47 = vld [vmem:[%s1215_s23] sm:$0xff]  ;;  %v465_v3 = vld [vmem:[%s1215_s23 + $0x30] sm:$0xff] }
  0x12   : > { %374 = vmatpush.bf16.msra.mxu0 %v335_v11  ;;  %v1015_v57 = vld [vmem:[%s1215_s23 + $0x40] sm:$0xff] }
  0x13   : > { %v1019_v60 = vld [vmem:[%s1215_s23 + $0x60] sm:$0xff] }
  0x15   : > { %347 = vperm.xlu0 %1039, %v337_v10   ;;  %1003 = vmatmul.msk.bf16.vlgmr.msra.gmra.mxu0 %vm360_vm0, %v331_v12  ;;  %v461_v12 = vld [vmem:[%s1215_s23 + $0x10] sm:$0xff] }
  0x25   : > { %1004 = vmatmul.msk.bf16.gmra.mxu0 %vm360_vm0, %v332_v1 }
  0x64   : > { %1050 = vset.pattern.permute.xlu1 %v1123_v0 }
  0x7f   : > { %v343_v13 = vpop.permute.xlu0 %342 }
  0x87   : > { %v348_v18 = vpop.permute.xlu0 %347 }
  0x92   : > { %v376_v14 = vpop.f32.mrf.mxu0 }
  0x93   : > { %v377_v15 = vadd.f32 %v376_v14, %v343_v13 }
  0x95   : > { %v388_v16 = vpack.c.bf16 %v377_v15, %v377_v15 }
  0x97   : > { %v420_v17 = vsel %vm418_vm1, %v388_v16, 0 }
  0x98   : > { %429 = vmatpush.bf16.msra.mxu1 %v420_v17  ;;  %v462_v17 = vld [vmem:[%s1215_s23 + $0x18] sm:$0xff] }
  0x9a   : > { %v378_v19 = vpop.f32.mrf.mxu0 }
  0x9b   : > { %v379_v20 = vadd.f32 %v378_v19, %v348_v18 }
  0x9d   : > { %v645_v21 = vpack.c.bf16 %v379_v20, %v379_v20 }
  0x9f   : > { %v675_v22 = vsel %vm418_vm1, %v645_v21, 0 }
  0xa0   : > { %684 = vmatpush.bf16.msra.mxu3 %v675_v22  ;;  %v1022_v22 = vld [vmem:[%s1215_s23 + $0x78] sm:$0xff] }
  0xbd   : > { %v1041_v23 = vpop.trf.xlu1 }
  0xbe   : > { %1005 = vmatmul.msk.bf16.vlgmr.msra.gmra.mxu1 %vm405_vm2, %v1041_v23  ;;  %v1018_v23 = vld [vmem:[%s1215_s23 + $0x58] sm:$0xff] }
  0xc5   : > { %v1042_v24 = vpop.trf.xlu1 }
  0xc6   : > { %1011 = vmatmul.msk.bf16.vlgmr.msra.gmra.mxu3 %vm405_vm2, %v1042_v24 }
  0xcd   : > { %v1043_v25 = vpop.trf.xlu1 }
  0xce   : > { %1006 = vmatmul.msk.bf16.gmra.mxu1 %vm405_vm2, %v1043_v25 }
  0xd5   : > { %v1044_v26 = vpop.trf.xlu1 }
  0xd6   : > { %1012 = vmatmul.msk.bf16.gmra.mxu3 %vm405_vm2, %v1044_v26 }
  0xdd   : > { %v1045_v27 = vpop.trf.xlu1 }
  0xde   : > { %1007 = vmatmul.msk.bf16.gmra.mxu1 %vm405_vm2, %v1045_v27 }
  0xe5   : > { %v1046_v28 = vpop.trf.xlu1 }
  0xe6   : > { %1013 = vmatmul.msk.bf16.gmra.mxu3 %vm405_vm2, %v1046_v28 }
  0xed   : > { %v1047_v29 = vpop.trf.xlu1 }
  0xee   : > { %1008 = vmatmul.msk.bf16.gmra.mxu1 %vm405_vm2, %v1047_v29 }
  0xf5   : > { %v1048_v30 = vpop.trf.xlu1 }
  0xf6   : > { %1014 = vmatmul.msk.bf16.gmra.mxu3 %vm405_vm2, %v1048_v30  ;;  %v460_v30 = vld [vmem:[%s1215_s23 + $0x8] sm:$0xff] }
 0x13b   : > { %v431_v31 = vpop.f32.mrf.mxu1 }
 0x13c   : > { %v451_v44 = vmul.f32 0.35355338, %v431_v31 }
 0x13e   : > { %v1228_v50 = vadd.f32 %v459_v47, %v451_v44 }
 0x140   : > { %v476_v55 = vsel %vm475_vm3, %v1228_v50, -inf }
 0x143   : > { %v1207_v32 = vpop.f32.mrf.mxu1 }
 0x144   : > { %v452_v28 = vmul.f32 0.35355338, %v1207_v32 }
 0x146   : > { %v1281_v31 = vadd.f32 %v460_v30, %v452_v28 }
 0x149   : > { %v686_v33 = vpop.f32.mrf.mxu3 }
 0x14a   : > { %v706_v54 = vmul.f32 0.35355338, %v686_v33 }
 0x14b   : > { %v436_v34 = vpop.f32.mrf.mxu1 }
 0x14c   : > { %v1245_v0 = vadd.f32 %v1015_v57, %v706_v54  ;;  %v453_v9 = vmul.f32 0.35355338, %v436_v34  ;;  %v479_v34 = vsel %vm475_vm3, %v1281_v31, -inf }
 0x14e   : > { %v731_v6 = vsel %vm475_vm3, %v1245_v0, -inf  ;;  %v1260_v13 = vadd.f32 %v461_v12, %v453_v9 }
 0x150   : > { %v482_v15 = vsel %vm475_vm3, %v1260_v13, -inf }
 0x151   : > { %v1209_v35 = vpop.f32.mrf.mxu3 }
 0x153   : > { %v438_v36 = vpop.f32.mrf.mxu1 }
 0x154   : > { %v454_v14 = vmul.f32 0.35355338, %v438_v36  ;;  %v1020_v36 = vld [vmem:[%s1215_s23 + $0x68] sm:$0xff] }
 0x156   : > { %v1265_v18 = vadd.f32 %v462_v17, %v454_v14 }
 0x158   : > { %v485_v20 = vsel %vm475_vm3, %v1265_v18, -inf }
 0x159   : > { %v691_v37 = vpop.f32.mrf.mxu3 }
 0x15a   : > { %v708_v39 = vmul.f32 0.35355338, %v691_v37 }
 0x15b   : > { %v441_v40 = vpop.f32.mrf.mxu1 }
 0x15c   : > { %v455_v42 = vmul.f32 0.35355338, %v441_v40  ;;  %v1219_v43 = vadd.f32 %v1017_v38, %v708_v39  ;;  %v338_v40 = vld [vmem:[%s1430_s3 + $0x10] sm:$0xff] }
 0x15e   : > { %v737_v45 = vsel %vm475_vm3, %v1219_v43, -inf  ;;  %v1223_v46 = vadd.f32 %v463_v41, %v455_v42  ;;  %v466_v41 = vld [vmem:[%s1215_s23 + $0x38] sm:$0xff] }
 0x15f   : > { %738 = vmax.xlane.f32.xlu0 %v737_v45  ;;  %v1021_v45 = vld [vmem:[%s1215_s23 + $0x70] sm:$0xff] }
 0x160   : > { %v488_v48 = vsel %vm475_vm3, %v1223_v46, -inf }
 0x161   : > { %v693_v49 = vpop.f32.mrf.mxu3  ;;  %489 = vmax.xlane.f32.xlu2 %v488_v48 }
 0x162   : > { %v709_v19 = vmul.f32 0.35355338, %v693_v49 }
 0x163   : > { %v443_v51 = vpop.f32.mrf.mxu1 }
 0x164   : > { %v456_v53 = vmul.f32 0.35355338, %v443_v51  ;;  %v1273_v26 = vadd.f32 %v1018_v23, %v709_v19  ;;  %v707_v51 = vmul.f32 0.35355338, %v1209_v35 }
 0x166   : > { %v1233_v56 = vadd.f32 %v464_v52, %v456_v53  ;;  %v740_v29 = vsel %vm475_vm3, %v1273_v26, -inf  ;;  %v1016_v52 = vld [vmem:[%s1215_s23 + $0x48] sm:$0xff] }
 0x167   : > { %477 = vmax.xlane.f32.xlu0 %v476_v55  ;;  %v1305_v53 = vadd.f32 %v1016_v52, %v707_v51  ;;  %v339_v55 = vld [vmem:[%s1430_s3 + $0x18] sm:$0xff] }
 0x168   : > { %v491_v58 = vsel %vm475_vm3, %v1233_v56, -inf }
 0x169   : > { %492 = vmax.xlane.f32.xlu2 %v491_v58  ;;  %v696_v59 = vpop.f32.mrf.mxu3  ;;  %v734_v54 = vsel %vm475_vm3, %v1305_v53, -inf }
 0x16a   : > { %v710_v63 = vmul.f32 0.35355338, %v696_v59 }
 0x16b   : > { %v446_v2 = vpop.f32.mrf.mxu1 }
 0x16c   : > { %v457_v4 = vmul.f32 0.35355338, %v446_v2  ;;  %v1248_v5 = vadd.f32 %v1019_v60, %v710_v63 }
 0x16e   : > { %v743_v7 = vsel %vm475_vm3, %v1248_v5, -inf  ;;  %v1255_v8 = vadd.f32 %v465_v3, %v457_v4 }
 0x16f   : > { %732 = vmax.xlane.f32.xlu0 %v731_v6 }
 0x170   : > { %v494_v10 = vsel %vm475_vm3, %v1255_v8, -inf }
 0x171   : > { %744 = vmax.xlane.f32.xlu2 %v743_v7  ;;  %v698_v11 = vpop.f32.mrf.mxu3  ;;  %495 = vmax.xlane.f32.xlu1 %v494_v10 }
 0x172   : > { %v711_v33 = vmul.f32 0.35355338, %v698_v11 }
 0x173   : > { %v448_v38 = vpop.f32.mrf.mxu1 }
 0x174   : > { %v1286_v37 = vadd.f32 %v1020_v36, %v711_v33  ;;  %v458_v39 = vmul.f32 0.35355338, %v448_v38 }
 0x176   : > { %v746_v32 = vsel %vm475_vm3, %v1286_v37, -inf  ;;  %v1294_v42 = vadd.f32 %v466_v41, %v458_v39 }
 0x178   : > { %v497_v47 = vsel %vm475_vm3, %v1294_v42, -inf }
 0x179   : > { %483 = vmax.xlane.f32.xlu2 %v482_v15  ;;  %v701_v16 = vpop.f32.mrf.mxu3 }
 0x17a   : > { %v712_v44 = vmul.f32 0.35355338, %v701_v16 }
 0x17c   : > { %v1299_v48 = vadd.f32 %v1021_v45, %v712_v44 }
 0x17e   : > { %v749_v49 = vsel %vm475_vm3, %v1299_v48, -inf }
 0x181   : > { %486 = vmax.xlane.f32.xlu2 %v485_v20  ;;  %v703_v21 = vpop.f32.mrf.mxu3 }
 0x182   : > { %v713_v24 = vmul.f32 0.35355338, %v703_v21 }
 0x184   : > { %v1271_v25 = vadd.f32 %v1022_v22, %v713_v24 }
 0x186   : > { %v752_v27 = vsel %vm475_vm3, %v1271_v25, -inf }
 0x187   : > { %753 = vmax.xlane.f32.xlu0 %v752_v27 }
 0x189   : > { %741 = vmax.xlane.f32.xlu2 %v740_v29 }
 0x191   : > { %480 = vmax.xlane.f32.xlu2 %v479_v34 }
 0x199   : > { %747 = vmax.xlane.f32.xlu2 %v746_v32 }
 0x19b   : > { %352 = vperm.xlu0 %1039, %v338_v40  }
 0x1a1   : > { %498 = vmax.xlane.f32.xlu2 %v497_v47 }
 0x1a9   : > { %750 = vmax.xlane.f32.xlu2 %v749_v49 }
 0x1b1   : > { %735 = vmax.xlane.f32.xlu2 %v734_v54 }
 0x1c9   : > { %357 = vperm.xlu2 %1049, %v339_v55  }
 0x1d2   : > { %v739_v57 = vpop.xlane.xlu0 %738 }
 0x1d3   : > { %v757_v22 = vsub.f32 %v1219_v43, %v739_v57 }
 0x1d4   : > { %v490_v58 = vpop.xlane.xlu2 %489 }
 0x1d5   : > { %v504_v30 = vsub.f32 %v1223_v46, %v490_v58 }
 0x1d7   : > { %v516_v34 = vmul.f32 1.442695, %v504_v30 }
 0x1da   : > { %v478_v59 = vpop.xlane.xlu0 %477 }
 0x1db   : > { %v500_v60 = vsub.f32 %v1228_v50, %v478_v59 }
 0x1dc   : > { %v493_v61 = vpop.xlane.xlu2 %492 }
 0x1dd   : > { %v508_v35 = vmul.f32 1.442695, %v500_v60  ;;  %v505_v16 = vsub.f32 %v1233_v56, %v493_v61 }
 0x1df   : > { %1051 = vpow2.f32 %v508_v35 }
 0x1e2   : > { %v733_v62 = vpop.xlane.xlu0 %732 }
 0x1e3   : > { %v755_v63 = vsub.f32 %v1245_v0, %v733_v62 }
 0x1e4   : > { %v1314_v1 = vpop.xlane.xlu2 %744  ;;  %v496_v28 = vpop.xlane.xlu1 %495 }
 0x1e5   : > { %v1316_v2 = vpop.eup %1051  ;;  %v763_v3 = vmul.f32 1.442695, %v755_v63  ;;  %v759_v55 = vsub.f32 %v1248_v5, %v1314_v1 }
 0x1e6   : > { %v524_v4 = vsel %vm475_vm3, %v1316_v2, 0.0 }
 0x1e7   : > { %1053 = vpow2.f32 %v763_v3  ;;  %525 = vadd.xlane.f32.xlu0 %v524_v4  ;;  %v771_v60 = vmul.f32 1.442695, %v759_v55 }
 0x1ec   : > { %v484_v6 = vpop.xlane.xlu2 %483 }
 0x1ed   : > { %v1320_v7 = vpop.eup %1053  ;;  %v502_v50 = vsub.f32 %v1260_v13, %v484_v6  ;;  %v518_v13 = vmul.f32 1.442695, %v505_v16 }
 0x1ee   : > { %v779_v9 = vsel %vm475_vm3, %v1320_v7, 0.0 }
 0x1ef   : > { %v512_v10 = vmul.f32 1.442695, %v502_v50  ;;  %780 = vadd.xlane.f32.xlu0 %v779_v9 }
 0x1f1   : > { %1055 = vpow2.f32 %v512_v10 }
 0x1f4   : > { %v487_v0 = vpop.xlane.xlu2 %486 }
 0x1f5   : > { %v503_v52 = vsub.f32 %v1265_v18, %v487_v0 }
 0x1f7   : > { %v1325_v11 = vpop.eup %1055  ;;  %v514_v59 = vmul.f32 1.442695, %v503_v52 }
 0x1f8   : > { %v530_v12 = vsel %vm475_vm3, %v1325_v11, 0.0 }
 0x1f9   : > { %531 = vadd.xlane.f32.xlu1 %v530_v12 }
 0x1fa   : > { %v754_v32 = vpop.xlane.xlu0 %753 }
 0x1fc   : > { %v742_v14 = vpop.xlane.xlu2 %741 }
 0x1fd   : > { %v758_v15 = vsub.f32 %v1273_v26, %v742_v14  ;;  %v767_v26 = vmul.f32 1.442695, %v757_v22 }
 0x1ff   : > { %v769_v17 = vmul.f32 1.442695, %v758_v15 }
 0x201   : > { %1057 = vpow2.f32 %v769_v17 }
 0x202   : > { %1059 = vpow2.f32 %v518_v13 }
 0x204   : > { %v481_v19 = vpop.xlane.xlu2 %480 }
 0x205   : > { %v501_v20 = vsub.f32 %v1281_v31, %v481_v19  ;;  %v506_v31 = vsub.f32 %v1255_v8, %v496_v28  ;;  %v762_v8 = vsub.f32 %v1271_v25, %v754_v32 }
 0x207   : > { %v1332_v21 = vpop.eup %1057  ;;  %v510_v23 = vmul.f32 1.442695, %v501_v20  ;;  %v520_v36 = vmul.f32 1.442695, %v506_v31  ;;  %v777_v47 = vmul.f32 1.442695, %v762_v8  ;;  %v381_v20 = vpop.f32.mrf.mxu0 }
 0x208   : > { %v788_v24 = vsel %vm475_vm3, %v1332_v21, 0.0  ;;  %v1060_v56 = vpop.eup %1059 }
 0x209   : > { %1061 = vpow2.f32 %v510_v23  ;;  %789 = vadd.xlane.f32.xlu1 %v788_v24  ;;  %v539_v43 = vsel %vm475_vm3, %v1060_v56, 0.0 }
 0x20a   : > { %1063 = vpow2.f32 %v767_v26 }
 0x20b   : > { %1065 = vpow2.f32 %v516_v34 }
 0x20c   : > { %v748_v27 = vpop.xlane.xlu2 %747  ;;  %1067 = vpow2.f32 %v520_v36 }
 0x20d   : > { %v760_v46 = vsub.f32 %v1286_v37, %v748_v27  ;;  %v353_v23 = vpop.permute.xlu0 %352 }
 0x20e   : > { %v382_v27 = vadd.f32 %v381_v20, %v353_v23 }
 0x20f   : > { %v1337_v29 = vpop.eup %1061  ;;  %v773_v45 = vmul.f32 1.442695, %v760_v46  ;;  %v383_v28 = vpop.f32.mrf.mxu0 }
 0x210   : > { %v527_v33 = vsel %vm475_vm3, %v1337_v29, 0.0  ;;  %v1344_v39 = vpop.eup %1063  ;;  %v549_v19 = vpack.c.bf16 %v1337_v29, %v1316_v2  ;;  %v548_v2 = vpack.c.bf16 %v382_v27, %v382_v27 }
 0x211   : > { %540 = vadd.xlane.f32.xlu1 %v539_v43  ;;  %528 = vadd.xlane.f32.xlu2 %v527_v33  ;;  %v785_v44 = vsel %vm475_vm3, %v1344_v39, 0.0  ;;  %v1066_v51 = vpop.eup %1065  ;;  %v880_v33 = vld [vmem:[%s1433_s6 + $0x8] sm:$0xff] }
 0x212   : > { %v1353_v54 = vpop.eup %1067  ;;  %v536_v57 = vsel %vm475_vm3, %v1066_v51, 0.0  ;;  %v551_v62 = vpack.c.bf16 %v1060_v56, %v1066_v51  ;;  %v557_v24 = vsel %vm475_vm3, %v549_v19, 0 }
 0x214   : > { %v499_v38 = vpop.xlane.xlu2 %498  ;;  %v563_v50 = vsel %vm475_vm3, %v551_v62, 0 }
 0x215   : > { %v507_v40 = vsub.f32 %v1294_v42, %v499_v38 }
 0x217   : > { %v522_v41 = vmul.f32 1.442695, %v507_v40 }
 0x219   : > { %1069 = vpow2.f32 %v522_v41  ;;  %786 = vadd.xlane.f32.xlu2 %v785_v44 }
 0x21a   : > { %1071 = vpow2.f32 %v773_v45  ;;  %v597_v45 = vlaneseq }
 0x21b   : > { %1073 = vpow2.f32 %v777_v47 }
 0x21c   : > { %v751_v49 = vpop.xlane.xlu2 %750  ;;  %v1388_v47 = vand.u32 127, %v597_v45 }
 0x21d   : > { %v761_v42 = vsub.f32 %v1299_v48, %v751_v49 }
 0x21e   : > { %v600_v52 = vadd.s32 4294967288, %v1388_v47  ;;  %v620_v20 = vadd.s32 4294967248, %v1388_v47 }
 0x21f   : > { %v1070_v37 = vpop.eup %1069  ;;  %v775_v25 = vmul.f32 1.442695, %v761_v42  ;;  %v879_v42 = vld [vmem:[%s1433_s6] sm:$0xff] }
 0x220   : > { %v552_v58 = vpack.c.bf16 %v1070_v37, %v1353_v54  ;;  %v1072_v61 = vpop.eup %1071  ;;  %v545_v15 = vsel %vm475_vm3, %v1070_v37, 0.0 }
 0x221   : > { %1075 = vpow2.f32 %v775_v25  ;;  %537 = vadd.xlane.f32.xlu2 %v536_v57  ;;  %v1074_v5 = vpop.eup %1073  ;;  %v794_v3 = vsel %vm475_vm3, %v1072_v61, 0.0 }
 0x222   : > { %v566_v18 = vsel %vm475_vm3, %v552_v58, 0  ;;  %1077 = vpow2.f32 %v514_v59  ;;  %v800_v34 = vsel %vm475_vm3, %v1074_v5, 0.0 }
 0x223   : > { %572 = vmatpush.bf16.xpose.msra.mxu2 %v566_v18  ;;  %1079 = vpow2.f32 %v771_v60  ;;  %v604_v18 = vadd.s32 4294967280, %v1388_v47 }
 0x224   : > { %v736_v48 = vpop.xlane.xlu2 %735 }
 0x225   : > { %v756_v35 = vsub.f32 %v1305_v53, %v736_v48 }
 0x227   : > { %v1076_v63 = vpop.eup %1075  ;;  %v765_v1 = vmul.f32 1.442695, %v756_v35 }
 0x228   : > { %v797_v4 = vsel %vm475_vm3, %v1076_v63, 0.0  ;;  %v807_v6 = vpack.c.bf16 %v1074_v5, %v1076_v63  ;;  %v1078_v10 = vpop.eup %1077 }
 0x229   : > { %1081 = vpow2.f32 %v765_v1  ;;  %795 = vadd.xlane.f32.xlu2 %v794_v3  ;;  %798 = vadd.xlane.f32.xlu1 %v797_v4  ;;  %v1080_v53 = vpop.eup %1079  ;;  %v550_v0 = vpack.c.bf16 %v1078_v10, %v1325_v11  ;;  %v805_v11 = vpack.c.bf16 %v1332_v21, %v1344_v39  ;;  %v533_v22 = vsel %vm475_vm3, %v1078_v10, 0.0 }
 0x22a   : > { %v821_v9 = vsel %vm475_vm3, %v807_v6, 0  ;;  %v806_v12 = vpack.c.bf16 %v1072_v61, %v1080_v53  ;;  %v791_v29 = vsel %vm475_vm3, %v1080_v53, 0.0  ;;  %v608_v61 = vadd.s32 4294967272, %v1388_v47 }
 0x22b   : > { %573 = vmatpush.bf16.xpose.msra.mxu2 %v563_v50  ;;  %827 = vmatpush.bf16.xpose.msrb.mxu0 %v821_v9  ;;  %v560_v17 = vsel %vm475_vm3, %v550_v0, 0  ;;  %v815_v26 = vsel %vm475_vm3, %v805_v11, 0  ;;  %v612_v9 = vadd.s32 4294967264, %v1388_v47 }
 0x22c   : > { %v818_v13 = vsel %vm475_vm3, %v806_v12, 0  ;;  %v358_v30 = vpop.permute.xlu2 %357 }
 0x22d   : > { %v384_v31 = vadd.f32 %v383_v28, %v358_v30 }
 0x22f   : > { %v1082_v14 = vpop.eup %1081  ;;  %v803_v43 = vpack.c.bf16 %v384_v31, %v384_v31 }
 0x230   : > { %v782_v16 = vsel %vm475_vm3, %v1082_v14, 0.0  ;;  %v804_v56 = vpack.c.bf16 %v1082_v14, %v1320_v7  ;;  %v542_v7 = vsel %vm475_vm3, %v1353_v54, 0.0 }
 0x231   : > { %546 = vadd.xlane.f32.xlu2 %v545_v15  ;;  %783 = vadd.xlane.f32.xlu0 %v782_v16 }
 0x232   : > { %v812_v21 = vsel %vm475_vm3, %v804_v56, 0 }
 0x233   : > { %574 = vmatpush.bf16.xpose.msra.mxu2 %v560_v17  ;;  %828 = vmatpush.bf16.xpose.msrb.mxu0 %v818_v13  ;;  %v616_v17 = vadd.s32 4294967256, %v1388_v47 }
 0x239   : > { %534 = vadd.xlane.f32.xlu0 %v533_v22 }
 0x23b   : > { %575 = vmatpush.bf16.xpose.msra.mxu2 %v557_v24  ;;  %829 = vmatpush.bf16.xpose.msrb.mxu0 %v815_v26 }
 0x241   : > { %792 = vadd.xlane.f32.xlu0 %v791_v29  ;;  %v624_v29 = vadd.s32 4294967240, %v1388_v47 }
 0x242   : > { %1009 = vmatmul.msk.bf16.vlgmr.msra.gmra.mxu2 %vm475_vm3, %v548_v2  ;;  %883 = vperm.xlu1 %1050, %v879_v42   ;;  %v875_v42 = vld [vmem:[%s1432_s5] sm:$0xff] }
 0x243   : > { %830 = vmatpush.bf16.xpose.msrb.mxu0 %v812_v21 }
 0x249   : > { %888 = vperm.xlu2 %1049, %v880_v33   ;;  %543 = vadd.xlane.f32.xlu0 %v542_v7 }
 0x24a   : > { %1023 = vmatmul.msk.bf16.vlgmr.msrb.gmra.mxu0 %vm475_vm3, %v803_v43 }
 0x251   : > { %801 = vadd.xlane.f32.xlu0 %v800_v34 }
 0x25a   : > { %v526_v36 = vpop.xlane.xlu0 %525 }
 0x262   : > { %v781_v39 = vpop.xlane.xlu0 %780 }
 0x26c   : > { %v532_v46 = vpop.xlane.xlu1 %531 }
 0x27c   : > { %v790_v44 = vpop.xlane.xlu1 %789 }
 0x284   : > { %v529_v38 = vpop.xlane.xlu2 %528  ;;  %v541_v37 = vpop.xlane.xlu1 %540 }
 0x285   : > { %1083 = vrcp.f32 %v529_v38 }
 0x286   : > { %1085 = vrcp.f32 %v526_v36 }
 0x28b   : > { %v1084_v54 = vpop.eup %1083 }
 0x28c   : > { %v787_v32 = vpop.xlane.xlu2 %786  ;;  %v1086_v55 = vpop.eup %1085  ;;  %v601_v58 = vperm.slane %v1084_v54, %v600_v52  ;;  %v876_v54 = vld [vmem:[%s1432_s5 + $0x8] sm:$0xff] }
 0x28d   : > { %v599_v48 = vperm.slane %v1086_v55, %v1388_v47  ;;  %v877_v55 = vpack.c.bf16 %v876_v54, %v875_v42 }
 0x28f   : > { %v603_v1 = vsel %vm602_vm4, %v601_v58, %v599_v48 }
 0x294   : > { %v538_v41 = vpop.xlane.xlu2 %537 }
 0x29c   : > { %v796_v49 = vpop.xlane.xlu2 %795  ;;  %v799_v10 = vpop.xlane.xlu1 %798 }
 0x2a4   : > { %v784_v40 = vpop.xlane.xlu0 %783  ;;  %v547_v3 = vpop.xlane.xlu2 %546 }
 0x2a5   : > { %1087 = vrcp.f32 %v784_v40 }
 0x2a6   : > { %1089 = vrcp.f32 %v781_v39 }
 0x2ab   : > { %v1088_v25 = vpop.eup %1087 }
 0x2ac   : > { %v535_v8 = vpop.xlane.xlu0 %534  ;;  %v1090_v57 = vpop.eup %1089  ;;  %v853_v35 = vperm.slane %v1088_v25, %v600_v52 }
 0x2ad   : > { %1091 = vrcp.f32 %v535_v8  ;;  %v852_v63 = vperm.slane %v1090_v57, %v1388_v47 }
 0x2ae   : > { %1093 = vrcp.f32 %v532_v46 }
 0x2af   : > { %1095 = vrcp.f32 %v787_v32  ;;  %v854_v0 = vsel %vm602_vm4, %v853_v35, %v852_v63 }
 0x2b0   : > { %1097 = vrcp.f32 %v538_v41 }
 0x2b3   : > { %v1092_v59 = vpop.eup %1091 }
 0x2b4   : > { %v793_v51 = vpop.xlane.xlu0 %792  ;;  %v1094_v60 = vpop.eup %1093  ;;  %v609_v4 = vperm.slane %v1092_v59, %v608_v61 }
 0x2b5   : > { %1099 = vrcp.f32 %v793_v51  ;;  %v1096_v62 = vpop.eup %1095  ;;  %v605_v50 = vperm.slane %v1094_v60, %v604_v18  ;;  %v884_v25 = vpop.permute.xlu1 %883 }
 0x2b6   : > { %1101 = vrcp.f32 %v790_v44  ;;  %v1098_v6 = vpop.eup %1097  ;;  %v855_v14 = vperm.slane %v1096_v62, %v604_v18  ;;  %v889_v59 = vpop.permute.xlu2 %888 }
 0x2b7   : > { %1103 = vrcp.f32 %v541_v37  ;;  %v607_v15 = vsel %vm606_vm5, %v605_v50, %v603_v1  ;;  %v613_v11 = vperm.slane %v1098_v6, %v612_v9 }
 0x2b8   : > { %v611_v13 = vsel %vm610_vm6, %v609_v4, %v607_v15  ;;  %v856_v23 = vsel %vm606_vm5, %v855_v14, %v854_v0 }
 0x2b9   : > { %v615_v30 = vsel %vm614_vm7, %v613_v11, %v611_v13 }
 0x2bb   : > { %v1100_v53 = vpop.eup %1099 }
 0x2bc   : > { %v544_v5 = vpop.xlane.xlu0 %543  ;;  %v1102_v12 = vpop.eup %1101  ;;  %v859_v22 = vperm.slane %v1100_v53, %v612_v9 }
 0x2bd   : > { %1105 = vrcp.f32 %v544_v5  ;;  %v1104_v16 = vpop.eup %1103  ;;  %v857_v24 = vperm.slane %v1102_v12, %v608_v61 }
 0x2be   : > { %1107 = vrcp.f32 %v796_v49  ;;  %v617_v2 = vperm.slane %v1104_v16, %v616_v17 }
 0x2bf   : > { %1109 = vrcp.f32 %v547_v3  ;;  %v858_v21 = vsel %vm610_vm6, %v857_v24, %v856_v23 }
 0x2c0   : > { %1111 = vrcp.f32 %v799_v10  ;;  %v860_v33 = vsel %vm614_vm7, %v859_v22, %v858_v21  ;;  %v619_v36 = vsel %vm618_vm8, %v617_v2, %v615_v30 }
 0x2c3   : > { %v1106_v19 = vpop.eup %1105 }
 0x2c4   : > { %v802_v26 = vpop.xlane.xlu0 %801  ;;  %v1108_v27 = vpop.eup %1107  ;;  %v621_v56 = vperm.slane %v1106_v19, %v620_v20 }
 0x2c5   : > { %1113 = vrcp.f32 %v802_v26  ;;  %v577_v28 = vpop.f32.mrf.mxu2  ;;  %v1110_v31 = vpop.eup %1109  ;;  %v861_v34 = vperm.slane %v1108_v27, %v616_v17 }
 0x2c6   : > { %v1112_v7 = vpop.eup %1111  ;;  %v623_v38 = vsel %vm622_vm9, %v621_v56, %v619_v36  ;;  %v625_v39 = vperm.slane %v1110_v31, %v624_v29 }
 0x2c7   : > { %v832_v43 = vpop.f32.mrf.mxu0  ;;  %v862_v32 = vsel %vm618_vm8, %v861_v34, %v860_v33  ;;  %v863_v46 = vperm.slane %v1112_v7, %v620_v20 }
 0x2c8   : > { %v627_v41 = vsel %vm626_vm10, %v625_v39, %v623_v38 }
 0x2c9   : > { %v864_v44 = vsel %vm622_vm9, %v863_v46, %v862_v32  ;;  %v641_v49 = vmul.f32 %v627_v41, %v577_v28 }
 0x2cb   : > { %v1114_v40 = vpop.eup %1113 }
 0x2cc   : > { %v865_v8 = vperm.slane %v1114_v40, %v624_v29 }
 0x2cd   : > { %v579_v45 = vpop.f32.mrf.mxu2 }
 0x2ce   : > { %v866_v47 = vsel %vm626_vm10, %v865_v8, %v864_v44 }
 0x2cf   : > { %v874_v51 = vmul.f32 %v866_v47, %v832_v43  ;;  %v834_v52 = vpop.f32.mrf.mxu0 }
 0x2d1   : > { %v878_v37 = vpack.c.bf16 %v874_v51, %v641_v49 }
 0x2d3   : > { %901 = vmatpush.bf16.msrb.mxu2 %v878_v37 }
 0x2d6   : > { %1024 = vmatmul.msk.bf16.vlgmr.msrb.gmra.mxu2 %vm360_vm0, %v877_v55 }
 0x359   : > { %v903_v57 = vpop.f32.mrf.mxu2 }
 0x35a   : > { %v904_v58 = vadd.f32 %v903_v57, %v884_v25 }
 0x35c   : > { %908 = vst.msk [vmem:[%s325_s22] sm:$0xff] %vm475_vm3, %v904_v58 }
 0x361   : > { %v905_v18 = vpop.f32.mrf.mxu2 }
 0x362   : > { %v906_v60 = vadd.f32 %v905_v18, %v889_v59 }
 0x364   : > { %909 = vst.msk [vmem:[%s325_s22 + $0x8] sm:$0xff] %vm475_vm3, %v906_v60 }
 0x365 PF: > { %s17_s24 = sadd.s32 1, %s1121_s24  }
 0x366   : > { %p14_p5 = scmp.ge.s32.totalorder %s17_s24, 4  }
 0x368   :  { %16 = sbr.rel (!%p14_p5) target bundleno = 1 (0x1), region = 86 }

</bundles_post_ra>
